<compile_context>
chip_gen: v7x
topology: tpu7x:2x2x1
jax: 0.10.0
libtpu: 0.0.40
codegen_flags: <defaults>
</compile_context>

<pallas_src>
import functools
import math

import jax
import jax.numpy as jnp
from jax.experimental import pallas as pl
from jax.experimental.pallas import tpu as pltpu

_SQRT_2_OVER_PI = math.sqrt(2.0 / math.pi)


def _gelu_tanh(x):
    # tanh-approximate GELU (lowers to the EUP tanh unit inside the kernel).
    # TODO(synk): PyTorch nn.GELU() defaults to the exact erf form; erf has no
    # Mosaic lowering, so the standard tanh approximation is used (|err|<~1e-3).
    return 0.5 * x * (1.0 + jnp.tanh(_SQRT_2_OVER_PI * (x + 0.044715 * (x * x * x))))


def _shortcut_kernel(x_ref, scale_ref, shift_ref, w_ref, b_ref, o_ref):
    # x_ref:     (1, C, t_hw)  input pixels, channels-major (native NCHW view)
    # scale_ref: (C, 1)        folded BatchNorm scale  = gamma / sqrt(var + eps)
    # shift_ref: (C, 1)        folded BatchNorm shift  = beta - mean * scale
    # w_ref:     (E, C)        1x1 conv weight
    # b_ref:     (E, 1)        conv bias
    # o_ref:     (1, E, t_hw)  output pixels (lane-dense last dim)
    x = x_ref[0].astype(jnp.float32)                       # (C, t_hw)
    xn = x * scale_ref[...] + shift_ref[...]               # BatchNorm (inference)
    g = _gelu_tanh(xn)                                     # GELU on VPU/EUP
    acc = jnp.dot(w_ref[...].astype(jnp.float32), g,
                  preferred_element_type=jnp.float32)      # (E, t_hw) on the MXU
    acc = acc + b_ref[...]                                 # f32 bias epilogue
    o_ref[0] = acc.astype(o_ref.dtype)


def _pick_pixel_tile(hw, cap=2048):
    """Largest multiple of 128 that divides hw (capped at `cap`), else hw itself."""
    best = None
    t = 128
    while t <= min(hw, cap):
        if hw % t == 0:
            best = t
        t += 128
    return best if best is not None else hw


@functools.partial(jax.jit, static_argnames=("eps",))
def shortcut(x, gamma, beta, running_mean, running_var, weight, bias, *, eps=1e-5):
    """x: (B, C, H, W); BN params: (C,); weight: (E, C, 1, 1); bias: (E,).

    Returns (B, E, H, W), matching Shortcut.forward with inference-mode BatchNorm.
    """
    B, C, H, W = x.shape
    E = weight.shape[0]
    HW = H * W

    # Fold BatchNorm (eval) into per-channel scale/shift (tiny, done by XLA).
    scale = (gamma * jax.lax.rsqrt(running_var + eps)).astype(jnp.float32)
    shift = (beta - running_mean * scale).astype(jnp.float32)

    x3 = x.reshape(B, C, HW)                     # free view of NCHW — no transpose
    w2d = weight.reshape(E, C)
    scale2d = scale.reshape(C, 1)
    shift2d = shift.reshape(C, 1)
    b2d = bias.reshape(E, 1).astype(jnp.float32)

    t_hw = _pick_pixel_tile(HW)
    grid = (B, HW // t_hw)

    itemsize = x.dtype.itemsize
    cost = pl.CostEstimate(
        flops=2 * B * HW * C * E + 10 * B * HW * C,
        transcendentals=B * HW * C,
        bytes_accessed=(B * C * HW * itemsize           # x
                        + E * C * 4 + (2 * C + E) * 4   # weight + bn/bias params
                        + B * E * HW * itemsize),       # output
    )

    out3 = pl.pallas_call(
        _shortcut_kernel,
        out_shape=jax.ShapeDtypeStruct((B, E, HW), x.dtype),
        grid_spec=pltpu.PrefetchScalarGridSpec(
            num_scalar_prefetch=0,
            grid=grid,
            in_specs=[
                pl.BlockSpec((1, C, t_hw), lambda b, j: (b, 0, j)),  # X pixel tile
                pl.BlockSpec((C, 1), lambda b, j: (0, 0)),           # BN scale
                pl.BlockSpec((C, 1), lambda b, j: (0, 0)),           # BN shift
                pl.BlockSpec((E, C), lambda b, j: (0, 0)),           # conv weight
                pl.BlockSpec((E, 1), lambda b, j: (0, 0)),           # conv bias
            ],
            out_specs=pl.BlockSpec((1, E, t_hw), lambda b, j: (b, 0, j)),
        ),
        compiler_params=pltpu.CompilerParams(
            dimension_semantics=("parallel", "parallel"),
        ),
        cost_estimate=cost,
    )(x3, scale2d, shift2d, w2d, b2d)

    return out3.reshape(B, E, H, W)


def _reference(x, gamma, beta, running_mean, running_var, weight, bias, eps=1e-5):
    # Pure-JAX reference of the (intended) PyTorch forward, eval-mode BN.
    B, C, H, W = x.shape
    E = weight.shape[0]
    scale = gamma / jnp.sqrt(running_var + eps)
    shift = beta - running_mean * scale
    xn = x * scale[None, :, None, None] + shift[None, :, None, None]
    g = _gelu_tanh(xn)
    y = jnp.einsum("bchw,ec->behw", g, weight.reshape(E, C)) + bias[None, :, None, None]
    return y


if __name__ == "__main__":
    # Small shapes consistent with the module: batch=2, in_channels=4, 16x16, out_channels=32.
    B, C, H, W, E = 2, 4, 16, 16, 32

    key = jax.random.PRNGKey(0)
    kx, kw, kb, kg, kbe, km, kv = jax.random.split(key, 7)
    x = jax.random.normal(kx, (B, C, H, W), dtype=jnp.float32)
    # Conv2d(in_channels, out_channels, 1) parameters.
    weight = jax.random.normal(kw, (E, C, 1, 1), dtype=jnp.float32) * 0.02
    bias = jax.random.normal(kb, (E,), dtype=jnp.float32) * 0.02
    # BatchNorm2d parameters / running statistics (inference mode).
    gamma = 1.0 + 0.1 * jax.random.normal(kg, (C,), dtype=jnp.float32)
    beta = 0.1 * jax.random.normal(kbe, (C,), dtype=jnp.float32)
    running_mean = 0.1 * jax.random.normal(km, (C,), dtype=jnp.float32)
    running_var = 1.0 + 0.1 * jax.random.uniform(kv, (C,), dtype=jnp.float32)

    out = shortcut(x, gamma, beta, running_mean, running_var, weight, bias, eps=1e-5)
    out = jax.block_until_ready(out)

    ref = _reference(x, gamma, beta, running_mean, running_var, weight, bias, eps=1e-5)
    assert out.shape == (B, E, H, W), out.shape
    max_err = float(jnp.max(jnp.abs(out - ref)))
    assert jnp.allclose(out, ref, atol=1e-4, rtol=1e-4), f"mismatch vs reference: {max_err}"

    print("KERNEL_OK")
</pallas_src>

<mosaic_0001>
module attributes {stable_mosaic.version = 11 : i64} {
  func.func @_shortcut_kernel(%arg0: i32, %arg1: i32, %arg2: memref<1x4x256xf32, #tpu.memory_space<vmem>>, %arg3: memref<4x1xf32, #tpu.memory_space<vmem>>, %arg4: memref<4x1xf32, #tpu.memory_space<vmem>>, %arg5: memref<32x4xf32, #tpu.memory_space<vmem>>, %arg6: memref<32x1xf32, #tpu.memory_space<vmem>>, %arg7: memref<1x32x256xf32, #tpu.memory_space<vmem>>) attributes {dimension_semantics = [#tpu.dimension_semantics<parallel>, #tpu.dimension_semantics<parallel>], iteration_bounds = array<i64: 2, 1>, scalar_prefetch = 0 : i64, scratch_operands = 0 : i64, tpu.core_type = #tpu.core_type<tc>, window_params = [{transform_indices = @transform_0, window_bounds = array<i64: 1, 4, 256>}, {pipeline_mode = #tpu.pipeline_mode<synchronous>, transform_indices = @transform_1, window_bounds = array<i64: 4, 1>}, {pipeline_mode = #tpu.pipeline_mode<synchronous>, transform_indices = @transform_2, window_bounds = array<i64: 4, 1>}, {pipeline_mode = #tpu.pipeline_mode<synchronous>, transform_indices = @transform_3, window_bounds = array<i64: 32, 4>}, {pipeline_mode = #tpu.pipeline_mode<synchronous>, transform_indices = @transform_4, window_bounds = array<i64: 32, 1>}, {transform_indices = @transform_5, window_bounds = array<i64: 1, 32, 256>}]} {
    %c0 = arith.constant 0 : index
    %c0_0 = arith.constant 0 : index
    %c0_1 = arith.constant 0 : index
    %0 = vector.load %arg2[%c0, %c0_0, %c0_1] : memref<1x4x256xf32, #tpu.memory_space<vmem>>, vector<1x4x256xf32>
    %1 = vector.shape_cast %0 : vector<1x4x256xf32> to vector<4x256xf32>
    %c0_2 = arith.constant 0 : index
    %c0_3 = arith.constant 0 : index
    %2 = vector.load %arg3[%c0_2, %c0_3] : memref<4x1xf32, #tpu.memory_space<vmem>>, vector<4x1xf32>
    %3 = vector.broadcast %2 : vector<4x1xf32> to vector<4x256xf32>
    %4 = arith.mulf %1, %3 : vector<4x256xf32>
    %c0_4 = arith.constant 0 : index
    %c0_5 = arith.constant 0 : index
    %5 = vector.load %arg4[%c0_4, %c0_5] : memref<4x1xf32, #tpu.memory_space<vmem>>, vector<4x1xf32>
    %6 = vector.broadcast %5 : vector<4x1xf32> to vector<4x256xf32>
    %7 = arith.addf %4, %6 : vector<4x256xf32>
    %cst = arith.constant 5.000000e-01 : f32
    %8 = vector.broadcast %cst : f32 to vector<4x256xf32>
    %9 = arith.mulf %8, %7 : vector<4x256xf32>
    %10 = arith.mulf %7, %7 : vector<4x256xf32>
    %11 = arith.mulf %10, %7 : vector<4x256xf32>
    %cst_6 = arith.constant 4.471500e-02 : f32
    %12 = vector.broadcast %cst_6 : f32 to vector<4x256xf32>
    %13 = arith.mulf %12, %11 : vector<4x256xf32>
    %14 = arith.addf %7, %13 : vector<4x256xf32>
    %cst_7 = arith.constant 0.797884583 : f32
    %15 = vector.broadcast %cst_7 : f32 to vector<4x256xf32>
    %16 = arith.mulf %15, %14 : vector<4x256xf32>
    %17 = math.tanh %16 : vector<4x256xf32>
    %cst_8 = arith.constant 1.000000e+00 : f32
    %18 = vector.broadcast %cst_8 : f32 to vector<4x256xf32>
    %19 = arith.addf %18, %17 : vector<4x256xf32>
    %20 = arith.mulf %9, %19 : vector<4x256xf32>
    %c0_9 = arith.constant 0 : index
    %c0_10 = arith.constant 0 : index
    %21 = vector.load %arg5[%c0_9, %c0_10] : memref<32x4xf32, #tpu.memory_space<vmem>>, vector<32x4xf32>
    %cst_11 = arith.constant dense<0.000000e+00> : vector<32x256xf32>
    %22 = tpu.matmul %21, %20, %cst_11 {dimension_numbers = #tpu.dot_dimension_numbers<[1], [0], [0], [1], [0, 0, 1, 1], [], []>} : vector<32x4xf32>, vector<4x256xf32>, vector<32x256xf32> -> vector<32x256xf32>
    %c0_12 = arith.constant 0 : index
    %c0_13 = arith.constant 0 : index
    %23 = vector.load %arg6[%c0_12, %c0_13] : memref<32x1xf32, #tpu.memory_space<vmem>>, vector<32x1xf32>
    %24 = vector.broadcast %23 : vector<32x1xf32> to vector<32x256xf32>
    %25 = arith.addf %22, %24 : vector<32x256xf32>
    %c0_14 = arith.constant 0 : index
    %c0_15 = arith.constant 0 : index
    %c0_16 = arith.constant 0 : index
    %26 = vector.load %arg7[%c0_14, %c0_15, %c0_16] : memref<1x32x256xf32, #tpu.memory_space<vmem>>, vector<1x32x256xf32>
    %27 = vector.shape_cast %26 : vector<1x32x256xf32> to vector<32x256xf32>
    %28 = vector.shape_cast %25 : vector<32x256xf32> to vector<1x32x256xf32>
    tpu.vector_store %arg7[%c0_14, %c0_15, %c0_16], %28 {strides = array<i32>} : memref<1x32x256xf32, #tpu.memory_space<vmem>>, vector<1x32x256xf32>,
    return
  }
  func.func @transform_0(%arg0: i32, %arg1: i32) -> (i32, i32, i32) {
    %c0_i32 = arith.constant 0 : i32
    %c0_i32_0 = arith.constant 0 : i32
    return %arg0, %c0_i32, %arg1 : i32, i32, i32
  }
  func.func @transform_1(%arg0: i32, %arg1: i32) -> (i32, i32) {
    %c0_i32 = arith.constant 0 : i32
    %c0_i32_0 = arith.constant 0 : i32
    %c0_i32_1 = arith.constant 0 : i32
    return %c0_i32, %c0_i32_0 : i32, i32
  }
  func.func @transform_2(%arg0: i32, %arg1: i32) -> (i32, i32) {
    %c0_i32 = arith.constant 0 : i32
    %c0_i32_0 = arith.constant 0 : i32
    %c0_i32_1 = arith.constant 0 : i32
    return %c0_i32, %c0_i32_0 : i32, i32
  }
  func.func @transform_3(%arg0: i32, %arg1: i32) -> (i32, i32) {
    %c0_i32 = arith.constant 0 : i32
    %c0_i32_0 = arith.constant 0 : i32
    %c0_i32_1 = arith.constant 0 : i32
    return %c0_i32, %c0_i32_0 : i32, i32
  }
  func.func @transform_4(%arg0: i32, %arg1: i32) -> (i32, i32) {
    %c0_i32 = arith.constant 0 : i32
    %c0_i32_0 = arith.constant 0 : i32
    %c0_i32_1 = arith.constant 0 : i32
    return %c0_i32, %c0_i32_0 : i32, i32
  }
  func.func @transform_5(%arg0: i32, %arg1: i32) -> (i32, i32, i32) {
    %c0_i32 = arith.constant 0 : i32
    %c0_i32_0 = arith.constant 0 : i32
    return %arg0, %c0_i32, %arg1 : i32, i32, i32
  }
}

</mosaic_0001>

<bundles_post_ra>
// kernel: shortcut.1
= control target key start
LH: loop header
LB: loop body
LE: loop exit
PB: predicated region body
PF: predicated region fallthrough
CT: control target
= control target key end

     0   :  { %s643_s18 = smov 0   ;;  %s645_s19 = smov 0   ;;  %s714_s0 = inlined_call_operand.vmem [shape: f32[2,4,256], index: 0, kind: input, shape index: {}]   ;;  %s715_s1 = inlined_call_operand.vmem [shape: f32[4,1], index: 1, kind: input, shape index: {}]   ;;  %s716_s2 = inlined_call_operand.vmem [shape: f32[4,1], index: 2, kind: input, shape index: {}]   ;;  %s717_s3 = inlined_call_operand.vmem [shape: f32[32,4], index: 3, kind: input, shape index: {}]   ;;  %s718_s4 = inlined_call_operand.vmem [shape: f32[32,1], index: 4, kind: input, shape index: {}]   ;;  %s719_s5 = inlined_call_operand.vmem [shape: f32[2,32,256], index: 5, kind: output, shape index: {}]  }
   0x1   :  { %s647_s20 = smov 0  }
   0x2 LB: > { %s27_s21 = sadd.s32 1, %s604_s19  ;;  %p538_p0 = scmp.ge.s32.totalorder %s608_s20, 1  ;;  %s608_s20 = sphi %s647_s20, %s15_s20   ;;  %s604_s19 = sphi %s645_s19, %s721_s19   ;;  %s600_s18 = sphi %s643_s18, %s720_s18  }
   0x3   : > { %p29_p1 = scmp.ge.s32.totalorder %s27_s21, 2  ;;  %p208_p2 = scmp.lt.s32.totalorder %s608_s20, 3 }
   0x5   : > { %s723_s21 = smov (%p29_p1, %s27_s21), 0  ;;  %p209_p3 = pnand %p538_p0, %p208_p2 }
   0x6   : > { %v265_v0 = vld [vmem:[%s715_s1] sm:$0xf] (!%p209_p3)  ;;  %v610_v1 = vmov (!%p209_p3), 0   ;;  %v308_v3 = vld [vmem:[%s718_s4 + $0x10] sm:$0xff] (!%p209_p3)  ;;  %v611_v4 = vmov (!%p209_p3), 0.0   ;;  %v307_v6 = vld [vmem:[%s718_s4 + $0x8] sm:$0xff] (!%p209_p3)  ;;  %v273_v10 = vlaneseq (!%p209_p3) }
   0x7   : > { %212 = sbr.rel (%p209_p3) target bundleno = 393 (0x189), region = 40  ;;  %582 = vset.pattern.permute.xlu0 (!%p209_p3), %v610_v1  ;;  %583 = vset.pattern.permute.xlu1 (!%p209_p3), %v610_v1  ;;  %v279_v2 = vld [vmem:[%s716_s2] sm:$0xf] (!%p209_p3)  ;;  %v309_v7 = vld [vmem:[%s718_s4 + $0x18] sm:$0xff] (!%p209_p3)  ;;  %p245_p4 = scmp.lt.s32.totalorder (!%p209_p3), %s600_s18, 1  ;;  %vm345_vm0 = vcmask (!%p209_p3), 1043456  }
   0x8   : > { %268 = vperm.xlu0 (!%p209_p3), %582, %v265_v0   ;;  %414 = vmatprep.mubr.f32.mxu0 (!%p209_p3), %v611_v4  ;;  %v306_v5 = vld [vmem:[%s718_s4] sm:$0xff] (!%p209_p3)  ;;  %v612_v8 = vmov (!%p209_p3), 839922192   ;;  %v274_v12 = vshrl.u32 (!%p209_p3), %v273_v10, 7  ;;  %vm332_vm1 = vcmask (!%p209_p3), 31744   ;;  %v304_v32 = vld [vmem:[%s717_s3 + $0x10] sm:$0xff] (!%p209_p3) }
   0x9   : > { %426 = vmatprep.mubr.f32.mxu1 (!%p209_p3), %v611_v4  ;;  %312 = vperm.xlu1 (!%p209_p3), %583, %v306_v5   ;;  %v271_v9 = vunpack.c.l.s4 (!%p209_p3), %v612_v8  ;;  %v302_v31 = vld [vmem:[%s717_s3] sm:$0xff] (!%p209_p3)  ;;  %v303_v33 = vld [vmem:[%s717_s3 + $0x8] sm:$0xff] (!%p209_p3)  ;;  %v305_v34 = vld [vmem:[%s717_s3 + $0x18] sm:$0xff] (!%p209_p3) }
   0xb   : > { %v272_v11 = vunpack.c.0.s8 (!%p209_p3), %v271_v9 }
   0xc   : > { %282 = vperm.xlu0 (!%p209_p3), %582, %v279_v2  }
   0xd   : > { %317 = vperm.xlu1 (!%p209_p3), %583, %v307_v6   ;;  %v275_v13 = vsub.s32 (!%p209_p3), %v272_v11, %v274_v12 }
   0xe   : > { %s725_s18 = smov (!%p245_p4, %s600_s18), 1 }
   0xf   : > { %s551_s9 = sshll.u32 %s725_s18, 3  ;;  %s552_s25 = sshll.u32 %s725_s18, 6 }
  0x10   : > { %322 = vperm.xlu0 %582, %v308_v3   ;;  %s252_s12 = scalar_lea.vmem %s714_s0, %s551_s9  ;;  %s262_s28 = scalar_lea.vmem %s719_s5, %s552_s25 }
  0x11   : > { %327 = vperm.xlu1 %583, %v309_v7   ;;  %v264_v16 = vld [vmem:[%s252_s12] sm:$0xff] }
  0x87   : > { %v269_v14 = vpop.permute.xlu0 %268 }
  0x88   : > { %v276_v15 = vrot.slane %v269_v14, %v275_v13  ;;  %v313_v35 = vpop.permute.xlu1 %312 }
  0x8a   : > { %v278_v18 = vmul.f32 %v276_v15, %v264_v16 }
  0x8b   : > { %v283_v17 = vpop.permute.xlu0 %282 }
  0x8c   : > { %v290_v19 = vrot.slane %v283_v17, %v275_v13  ;;  %v318_v36 = vpop.permute.xlu1 %317 }
  0x8e   : > { %v292_v20 = vadd.f32 %v290_v19, %v278_v18 }
  0x8f   : > { %v323_v37 = vpop.permute.xlu0 %322 }
  0x90   : > { %v294_v21 = vmul.f32 %v292_v20, %v292_v20  ;;  %v293_v27 = vmul.f32 0.5, %v292_v20  ;;  %v328_v46 = vpop.permute.xlu1 %327 }
  0x92   : > { %v295_v22 = vmul.f32 %v294_v21, %v292_v20 }
  0x94   : > { %v296_v23 = vmul.f32 0.044715, %v295_v22 }
  0x96   : > { %v297_v24 = vadd.f32 %v296_v23, %v292_v20 }
  0x98   : > { %v298_v25 = vmul.f32 0.7978846, %v297_v24 }
  0x9a   : > { %584 = vtanh.f32 %v298_v25 }
  0xa4   : > { %v585_v26 = vpop.eup %584 }
  0xa5   : > { %v300_v28 = vadd.f32 1.0, %v585_v26 }
  0xa7   : > { %v301_v29 = vmul.f32 %v300_v28, %v293_v27 }
  0xa9   : > { %v331_v30 = vcombine.high %v301_v29, %v301_v29 }
  0xab   : > { %543 = vmatprep.subr.msk.mxu0 %vm345_vm0, %v331_v30  ;;  %553 = vmatprep.subr.msk.mxu1 %vm345_vm0, %v331_v30 }
  0xac   : > { %544 = vmatpush1.msk.msra.mxu0 %vm345_vm0, %v301_v29  ;;  %554 = vmatpush1.msk.msra.mxu1 %vm345_vm0, %v301_v29 }
  0xad   : > { %545 = vmatmul.mubr.msk.f32.vlgmr.msra.gmra.mrb[0].mxu0 %vm332_vm1, %v302_v31  ;;  %547 = vmatmul.mubr.msk.f32.vlgmr.msra.gmra.mrb[0].mxu1 %vm332_vm1, %v304_v32 }
  0xae   : > { %420 = vmatprep.mubr.f32.mxu0 %v611_v4  ;;  %432 = vmatprep.mubr.f32.mxu1 %v611_v4 }
  0xb1   : > { %546 = vmatmul.mubr.msk.f32.gmra.mrb[2].mxu0 %vm332_vm1, %v303_v33  ;;  %548 = vmatmul.mubr.msk.f32.gmra.mrb[2].mxu1 %vm332_vm1, %v305_v34 }
 0x180   : > { %v416_v38 = vpop.f32.mrb[0].mxu0  ;;  %v428_v39 = vpop.f32.mrb[0].mxu1 }
 0x181   : > { %v417_v40 = vadd.f32 %v416_v38, %v313_v35  ;;  %v429_v41 = vadd.f32 %v428_v39, %v323_v37  ;;  %v418_v42 = vpop.f32.mrb[1].mxu0  ;;  %v430_v43 = vpop.f32.mrb[1].mxu1 }
 0x182   : > { %v419_v44 = vadd.f32 %v418_v42, %v313_v35  ;;  %v431_v45 = vadd.f32 %v430_v43, %v323_v37 }
 0x183   : > { %439 = vst [vmem:[%s262_s28] sm:$0xff] %v417_v40  ;;  %443 = vst [vmem:[%s262_s28 + $0x20] sm:$0xff] %v429_v41 }
 0x184   : > { %440 = vst [vmem:[%s262_s28 + $0x8] sm:$0xff] %v419_v44  ;;  %444 = vst [vmem:[%s262_s28 + $0x28] sm:$0xff] %v431_v45  ;;  %v422_v47 = vpop.f32.mrb[2].mxu0  ;;  %v434_v48 = vpop.f32.mrb[2].mxu1 }
 0x185   : > { %v423_v49 = vadd.f32 %v422_v47, %v318_v36  ;;  %v435_v50 = vadd.f32 %v434_v48, %v328_v46  ;;  %v424_v51 = vpop.f32.mrb[3].mxu0  ;;  %v436_v52 = vpop.f32.mrb[3].mxu1 }
 0x186   : > { %v425_v53 = vadd.f32 %v424_v51, %v318_v36  ;;  %v437_v54 = vadd.f32 %v436_v52, %v328_v46 }
 0x187   : > { %441 = vst [vmem:[%s262_s28 + $0x10] sm:$0xff] %v423_v49  ;;  %445 = vst [vmem:[%s262_s28 + $0x30] sm:$0xff] %v435_v50 }
 0x188   : > { %442 = vst [vmem:[%s262_s28 + $0x18] sm:$0xff] %v425_v53  ;;  %446 = vst [vmem:[%s262_s28 + $0x38] sm:$0xff] %v437_v54 }
 0x189 PF: > { %s15_s20 = sadd.s32 1, %s608_s20   ;;  %s720_s18 = smov %s604_s19 }
 0x18a   : > { %p12_p5 = scmp.ge.s32.totalorder %s15_s20, 4   ;;  %s721_s19 = smov %s723_s21 }
 0x18c   :  { %14 = sbr.rel (!%p12_p5) target bundleno = 2 (0x2), region = 70 }

</bundles_post_ra>
